<compile_context>
chip_gen: v7x
topology: tpu7x:2x2x1
jax: 0.10.0
libtpu: 0.0.40
codegen_flags: <defaults>
</compile_context>

<pallas_src>
import functools

import jax
import jax.numpy as jnp
from jax.experimental import pallas as pl
from jax.experimental.pallas import tpu as pltpu

_LANE = 128


def _round_up(x, m):
    return ((x + m - 1) // m) * m


def _round_down(x, m):
    return (x // m) * m


def _cdiv(a, b):
    return (a + b - 1) // b


def _sublane(dtype):
    # f32 -> 8, bf16 -> 16, int8/fp8 -> 32
    return max(8, 32 // jnp.dtype(dtype).itemsize)


def _tpu_vmem_bytes():
    try:
        return int(pltpu.get_tpu_info().vmem_capacity_bytes)
    except Exception:
        return 64 * 1024 * 1024


def _num_tensorcores():
    # Conservative: default to 1 (v5e/v6e behavior: one big tile, no split).
    # Only split the parallel axis when a multi-TensorCore part is detected.
    try:
        info = pltpu.get_tpu_info()
        for name in ("num_tensorcores", "tensorcores_per_chip", "num_cores",
                     "core_count"):
            v = getattr(info, name, None)
            if v:
                return max(1, min(int(v), 8))
    except Exception:
        pass
    return 1


def _budgets(dtype, max_block_elems=None):
    """(max elements per x block, vmem_limit_bytes) for this chip & dtype."""
    itemsize = jnp.dtype(dtype).itemsize
    vmem = _tpu_vmem_bytes()
    # 128 MiB parts (v5e/v6e): scoped VMEM up to ~96 MiB; 64 MiB parts (v7x):
    # stay <= 48 MiB.
    vmem_limit = int(min((3 * vmem) // 4, 96 << 20))
    # Effective per-element VMEM footprint of one x block:
    #   2x double-buffered input + 2x double-buffered output at input dtype
    #   plus ~2 block-sized f32 temporaries inside the kernel (stats sweeps).
    per_elem = 4 * itemsize + 2 * 4
    budget = max_block_elems
    if budget is None:
        budget = (vmem_limit - (8 << 20)) // per_elem
    budget = max(int(budget), _sublane(dtype) * _LANE)
    return budget, vmem_limit


def _pick_row_tile(bc, max_rows, sub, num_cores):
    """Rows per block: largest VMEM allows; split only on multi-core parts."""
    row_tile = max(_round_down(max_rows, sub), sub)
    row_tile = min(row_tile, _round_up(bc, sub))
    if num_cores >= 2:
        # Give the parallel row axis >= num_cores (prefer >= 2*num_cores)
        # grid steps so every TensorCore streams and still double-buffers.
        for steps in (2 * num_cores, num_cores):
            if bc >= steps * sub:
                row_tile = min(row_tile, _round_up(_cdiv(bc, steps), sub))
                break
    if row_tile > bc:
        # Single full-extent block (legal for any bc, avoids a partial block).
        row_tile = bc
    return row_tile


# --------------------- single-pass kernel (whole H*W resident) ---------------

def _adain_fused_kernel(x_ref, wb_ref, o_ref, *, eps, inv_hw):
    # x_ref:  (rows, HW)  one row == one (b, c) instance (full spatial extent)
    # wb_ref: (rows, 2)   fused [weight, bias]
    # Two-sweep centered variance: x is VMEM resident (vld is cheap), and the
    # centered form is robust when |mean| >> std, matching F.batch_norm.
    # x is re-read per sweep so no block-sized f32 copy has to stay live.
    mean = jnp.sum(x_ref[...].astype(jnp.float32), axis=1, keepdims=True) * inv_hw
    d = x_ref[...].astype(jnp.float32) - mean
    var = jnp.sum(d * d, axis=1, keepdims=True) * inv_hw
    inv = jax.lax.rsqrt(var + eps)
    wb = wb_ref[...]
    a = inv * wb[:, 0:1]          # effective scale
    c = wb[:, 1:2] - mean * a     # effective shift
    o_ref[...] = (x_ref[...].astype(jnp.float32) * a + c).astype(o_ref.dtype)


# --------------------- chunked path kernels (large H*W) ----------------------

def _stats_finalize_kernel(x_ref, wb_ref, p_ref, *, eps, hw, hw_tile, mask_tail):
    # Pass 1 kernel: accumulate per-row [sum, sumsq] into the resident (rows,2)
    # output across H*W chunks; on the last chunk overwrite it in place with
    # the folded [scale, shift] (normalization + affine), so no host finalize.
    j = pl.program_id(1)

    @pl.when(j == 0)
    def _():
        p_ref[...] = jnp.zeros_like(p_ref)

    x = x_ref[...].astype(jnp.float32)
    if mask_tail:
        # Mask the H*W tail of the last (partial) chunk: padded lanes hold
        # garbage and would otherwise corrupt the per-row sums.
        col = jax.lax.broadcasted_iota(jnp.int32, x.shape, 1) + j * hw_tile
        x = jnp.where(col < hw, x, 0.0)
    p_ref[:, 0:1] += jnp.sum(x, axis=1, keepdims=True)
    p_ref[:, 1:2] += jnp.sum(x * x, axis=1, keepdims=True)

    @pl.when(j == pl.num_programs(1) - 1)
    def _():
        acc = p_ref[...]
        inv_hw = 1.0 / hw
        mean = acc[:, 0:1] * inv_hw
        # E[x^2] - mean^2 in f32, clamped >= 0 against cancellation.
        var = jnp.maximum(acc[:, 1:2] * inv_hw - mean * mean, 0.0)
        inv = jax.lax.rsqrt(var + eps)
        wb = wb_ref[...]
        a = inv * wb[:, 0:1]
        c = wb[:, 1:2] - mean * a
        p_ref[:, 0:1] = a
        p_ref[:, 1:2] = c


def _apply_kernel(x_ref, p_ref, o_ref):
    # p_ref: (rows, 2) fused [scale, shift].
    p = p_ref[...]
    o_ref[...] = (x_ref[...].astype(jnp.float32) * p[:, 0:1]
                  + p[:, 1:2]).astype(o_ref.dtype)


# ------------------------------- wrapper --------------------------------------

def adaptive_instance_norm_2d(x, weight, bias, *, eps=1e-05, max_block_elems=None):
    """AdaIN forward. x: (B, C, H, W); weight/bias: (B*C,)."""
    B, C, H, W = x.shape
    BC, HW = B * C, H * W
    sub = _sublane(x.dtype)
    num_cores = _num_tensorcores()
    budget, vmem_limit = _budgets(x.dtype, max_block_elems)

    x2d = x.reshape(BC, HW)                      # contiguous view: free
    w1 = weight.reshape(BC).astype(jnp.float32)
    b1 = bias.reshape(BC).astype(jnp.float32)

    single_pass = HW * sub <= budget

    if single_pass:
        # ---- one fused pass: whole spatial extent resident per block -------
        row_tile = _pick_row_tile(BC, budget // HW, sub, num_cores)
        n_row = _cdiv(BC, row_tile)
        bc_rows = n_row * row_tile

        wb = jnp.stack([w1, b1], axis=1)         # (BC, 2) fused weight/bias
        if bc_rows != BC:
            # Only the tiny (BC, 2) array is padded; x/out use partial tail
            # blocks whose garbage rows never reach HBM.
            wb = jnp.pad(wb, ((0, bc_rows - BC), (0, 0)))

        out2d = pl.pallas_call(
            functools.partial(_adain_fused_kernel, eps=eps, inv_hw=1.0 / HW),
            out_shape=jax.ShapeDtypeStruct((BC, HW), x.dtype),
            grid_spec=pltpu.PrefetchScalarGridSpec(
                num_scalar_prefetch=0,
                grid=(n_row,),
                in_specs=[
                    pl.BlockSpec((row_tile, HW), lambda i: (i, 0)),
                    pl.BlockSpec((row_tile, 2), lambda i: (i, 0)),
                ],
                out_specs=pl.BlockSpec((row_tile, HW), lambda i: (i, 0)),
            ),
            compiler_params=pltpu.CompilerParams(
                dimension_semantics=("parallel",),
                vmem_limit_bytes=vmem_limit,
            ),
        )(x2d, wb)
        return out2d.reshape(B, C, H, W)

    # ---- large H*W: two streaming passes, spatial axis chunked --------------
    hw_tile = max(_round_down(budget // sub, _LANE), _LANE)
    hw_tile = min(hw_tile, _round_up(HW, _LANE))
    n_hw = _cdiv(HW, hw_tile)
    row_tile = _pick_row_tile(BC, budget // hw_tile, sub, num_cores)
    n_row = _cdiv(BC, row_tile)
    bc_rows = n_row * row_tile

    wb = jnp.stack([w1, b1], axis=1)             # (BC, 2)
    if bc_rows != BC:
        wb = jnp.pad(wb, ((0, bc_rows - BC), (0, 0)))

    # Pass 1: per-instance sum / sum-of-squares (reduction axis last), affine
    # fold fused into the last reduction step -> (scale, shift) params.
    # TODO(synk): when BC < 2*row_tile on multi-core parts this pass occupies
    #             one core; a 2-way split of the H*W reduction would recover it.
    params = pl.pallas_call(
        functools.partial(_stats_finalize_kernel, eps=eps, hw=HW,
                          hw_tile=hw_tile, mask_tail=(HW % hw_tile != 0)),
        out_shape=jax.ShapeDtypeStruct((bc_rows, 2), jnp.float32),
        grid_spec=pltpu.PrefetchScalarGridSpec(
            num_scalar_prefetch=0,
            grid=(n_row, n_hw),
            in_specs=[
                pl.BlockSpec((row_tile, hw_tile), lambda i, j: (i, j)),
                pl.BlockSpec((row_tile, 2), lambda i, j: (i, 0)),
            ],
            out_specs=pl.BlockSpec((row_tile, 2), lambda i, j: (i, 0)),
        ),
        compiler_params=pltpu.CompilerParams(
            dimension_semantics=("parallel", "arbitrary"),
            vmem_limit_bytes=vmem_limit,
        ),
    )(x2d, wb)

    # Pass 2: re-stream x and apply x * scale + shift.
    out2d = pl.pallas_call(
        _apply_kernel,
        out_shape=jax.ShapeDtypeStruct((BC, HW), x.dtype),
        grid_spec=pltpu.PrefetchScalarGridSpec(
            num_scalar_prefetch=0,
            grid=(n_row, n_hw),
            in_specs=[
                pl.BlockSpec((row_tile, hw_tile), lambda i, j: (i, j)),
                pl.BlockSpec((row_tile, 2), lambda i, j: (i, 0)),
            ],
            out_specs=pl.BlockSpec((row_tile, hw_tile), lambda i, j: (i, j)),
        ),
        compiler_params=pltpu.CompilerParams(
            dimension_semantics=("parallel", "parallel"),
            vmem_limit_bytes=vmem_limit,
        ),
    )(x2d, params)

    return out2d.reshape(B, C, H, W)


def _reference(x, weight, bias, eps=1e-05):
    B, C, H, W = x.shape
    xr = x.reshape(B * C, H * W).astype(jnp.float32)
    mean = xr.mean(axis=1, keepdims=True)
    var = ((xr - mean) ** 2).mean(axis=1, keepdims=True)
    out = (xr - mean) / jnp.sqrt(var + eps)
    out = (out * weight.reshape(-1, 1).astype(jnp.float32)
           + bias.reshape(-1, 1).astype(jnp.float32))
    return out.reshape(B, C, H, W).astype(x.dtype)


if __name__ == "__main__":
    key = jax.random.PRNGKey(0)

    # ---- aligned shape (B*C = 8, H*W = 256) --------------------------------
    B, C, H, W = 2, 4, 16, 16
    kx, kw, kb, k2 = jax.random.split(key, 4)
    x = jax.random.normal(kx, (B, C, H, W), dtype=jnp.float32)
    weight = jax.random.normal(kw, (B * C,), dtype=jnp.float32)
    bias = jax.random.normal(kb, (B * C,), dtype=jnp.float32)
    ref = _reference(x, weight, bias, eps=1e-05)

    # Fused single-pass path (whole spatial extent resident per block).
    out = jax.block_until_ready(adaptive_instance_norm_2d(x, weight, bias, eps=1e-05))
    assert out.shape == (B, C, H, W)
    assert jnp.allclose(out, ref, atol=1e-5, rtol=1e-5)

    # Chunked two-pass path (forced via a tiny per-block element budget).
    out_chunked = jax.block_until_ready(
        adaptive_instance_norm_2d(x, weight, bias, eps=1e-05, max_block_elems=1024))
    assert out_chunked.shape == (B, C, H, W)
    assert jnp.allclose(out_chunked, ref, atol=1e-5, rtol=1e-5)

    # ---- non-aligned shape (B*C = 9, H*W = 130): exercises partial row
    # blocks and the in-kernel H*W tail mask (no HBM padding anywhere). -----
    B2, C2, H2, W2 = 3, 3, 10, 13
    kx2, kw2, kb2 = jax.random.split(k2, 3)
    x2 = jax.random.normal(kx2, (B2, C2, H2, W2), dtype=jnp.float32)
    w2 = jax.random.normal(kw2, (B2 * C2,), dtype=jnp.float32)
    b2 = jax.random.normal(kb2, (B2 * C2,), dtype=jnp.float32)
    ref2 = _reference(x2, w2, b2, eps=1e-05)

    out2 = jax.block_until_ready(adaptive_instance_norm_2d(x2, w2, b2, eps=1e-05))
    assert out2.shape == (B2, C2, H2, W2)
    assert jnp.allclose(out2, ref2, atol=1e-5, rtol=1e-5)

    out2c = jax.block_until_ready(
        adaptive_instance_norm_2d(x2, w2, b2, eps=1e-05, max_block_elems=1024))
    assert out2c.shape == (B2, C2, H2, W2)
    assert jnp.allclose(out2c, ref2, atol=1e-5, rtol=1e-5)

    print("KERNEL_OK")
</pallas_src>

<mosaic_0001>
module attributes {stable_mosaic.version = 11 : i64} {
  func.func @_adain_fused_kernel(%arg0: i32, %arg1: memref<8x256xf32, #tpu.memory_space<vmem>>, %arg2: memref<8x2xf32, #tpu.memory_space<vmem>>, %arg3: memref<8x256xf32, #tpu.memory_space<vmem>>) attributes {dimension_semantics = [#tpu.dimension_semantics<parallel>], iteration_bounds = array<i64: 1>, scalar_prefetch = 0 : i64, scratch_operands = 0 : i64, tpu.core_type = #tpu.core_type<tc>, window_params = [{transform_indices = @transform_0, window_bounds = array<i64: 8, 256>}, {transform_indices = @transform_1, window_bounds = array<i64: 8, 2>}, {transform_indices = @transform_2, window_bounds = array<i64: 8, 256>}]} {
    %c0 = arith.constant 0 : index
    %c0_0 = arith.constant 0 : index
    %0 = vector.load %arg1[%c0, %c0_0] : memref<8x256xf32, #tpu.memory_space<vmem>>, vector<8x256xf32>
    %cst = arith.constant dense<0.000000e+00> : vector<8xf32>
    %1 = vector.multi_reduction <add>, %0, %cst [1] : vector<8x256xf32> to vector<8xf32>
    %2 = vector.shape_cast %1 : vector<8xf32> to vector<8x1xf32>
    %cst_1 = arith.constant 3.906250e-03 : f32
    %3 = vector.broadcast %cst_1 : f32 to vector<8x1xf32>
    %4 = arith.mulf %2, %3 : vector<8x1xf32>
    %c0_2 = arith.constant 0 : index
    %c0_3 = arith.constant 0 : index
    %5 = vector.load %arg1[%c0_2, %c0_3] : memref<8x256xf32, #tpu.memory_space<vmem>>, vector<8x256xf32>
    %6 = vector.broadcast %4 : vector<8x1xf32> to vector<8x256xf32>
    %7 = arith.subf %5, %6 : vector<8x256xf32>
    %8 = arith.mulf %7, %7 : vector<8x256xf32>
    %cst_4 = arith.constant dense<0.000000e+00> : vector<8xf32>
    %9 = vector.multi_reduction <add>, %8, %cst_4 [1] : vector<8x256xf32> to vector<8xf32>
    %10 = vector.shape_cast %9 : vector<8xf32> to vector<8x1xf32>
    %cst_5 = arith.constant 3.906250e-03 : f32
    %11 = vector.broadcast %cst_5 : f32 to vector<8x1xf32>
    %12 = arith.mulf %10, %11 : vector<8x1xf32>
    %cst_6 = arith.constant 9.99999974E-6 : f32
    %13 = vector.broadcast %cst_6 : f32 to vector<8x1xf32>
    %14 = arith.addf %12, %13 : vector<8x1xf32>
    %15 = math.rsqrt %14 : vector<8x1xf32>
    %c0_7 = arith.constant 0 : index
    %c0_8 = arith.constant 0 : index
    %16 = vector.load %arg2[%c0_7, %c0_8] : memref<8x2xf32, #tpu.memory_space<vmem>>, vector<8x2xf32>
    %17 = vector.extract_strided_slice %16 {offsets = [0, 0], sizes = [8, 1], strides = [1, 1]} : vector<8x2xf32> to vector<8x1xf32>
    %18 = arith.mulf %15, %17 : vector<8x1xf32>
    %19 = vector.extract_strided_slice %16 {offsets = [0, 1], sizes = [8, 1], strides = [1, 1]} : vector<8x2xf32> to vector<8x1xf32>
    %20 = arith.mulf %4, %18 : vector<8x1xf32>
    %21 = arith.subf %19, %20 : vector<8x1xf32>
    %c0_9 = arith.constant 0 : index
    %c0_10 = arith.constant 0 : index
    %22 = vector.load %arg1[%c0_9, %c0_10] : memref<8x256xf32, #tpu.memory_space<vmem>>, vector<8x256xf32>
    %23 = vector.broadcast %18 : vector<8x1xf32> to vector<8x256xf32>
    %24 = arith.mulf %22, %23 : vector<8x256xf32>
    %25 = vector.broadcast %21 : vector<8x1xf32> to vector<8x256xf32>
    %26 = arith.addf %24, %25 : vector<8x256xf32>
    %c0_11 = arith.constant 0 : index
    %c0_12 = arith.constant 0 : index
    %27 = vector.load %arg3[%c0_11, %c0_12] : memref<8x256xf32, #tpu.memory_space<vmem>>, vector<8x256xf32>
    tpu.vector_store %arg3[%c0_11, %c0_12], %26 {strides = array<i32>} : memref<8x256xf32, #tpu.memory_space<vmem>>, vector<8x256xf32>,
    return
  }
  func.func @transform_0(%arg0: i32) -> (i32, i32) {
    %c0_i32 = arith.constant 0 : i32
    %c0_i32_0 = arith.constant 0 : i32
    return %arg0, %c0_i32 : i32, i32
  }
  func.func @transform_1(%arg0: i32) -> (i32, i32) {
    %c0_i32 = arith.constant 0 : i32
    %c0_i32_0 = arith.constant 0 : i32
    return %arg0, %c0_i32 : i32, i32
  }
  func.func @transform_2(%arg0: i32) -> (i32, i32) {
    %c0_i32 = arith.constant 0 : i32
    %c0_i32_0 = arith.constant 0 : i32
    return %arg0, %c0_i32 : i32, i32
  }
}

</mosaic_0001>

<bundles_post_ra>
// kernel: tpu_custom_call.1
= control target key start
LH: loop header
LB: loop body
LE: loop exit
PB: predicated region body
PF: predicated region fallthrough
CT: control target
= control target key end

     0   :  { %7 = vsyncpa [#allocation3], 0  ;;  %s183_s0 = inlined_call_operand.hbm [shape: f32[8,256], index: 0, kind: input, shape index: {}]   ;;  %s184_s1 = inlined_call_operand.vmem [shape: f32[8,2], index: 1, kind: input, shape index: {}]   ;;  %s185_s2 = inlined_call_operand.hbm [shape: f32[8,256], index: 2, kind: output, shape index: {}]  }
   0x1   :  { %8 = vsyncpa [#allocation4], 0  ;;  %s136_s9 = smov [#allocation2]   ;;  %s88_s13 = scalar_lea.hbm %s183_s0, 256 }
   0x2   :  { %s15_s10 = sshll.u32 %s136_s9, 4  ;;  %p89_p0 = scmp.ne.s32.totalorder %s183_s0, %s88_s13  ;;  %s16_s10 = int_to_ptr.vmem [resolvable:$true] %s15_s10 }
   0x3   :  { %p92_p1 = scmp.lt.u32.totalorder %s88_s13, %s183_s0 }
   0x5   :  { %p94_p2 = pnand %p92_p1, %p89_p0 }
   0x7   :  { %97 = shalt.err (!%p94_p2)
}
   0x8   :  { %s98_s18 = scalar_lea.vmem %s16_s10, 256  ;;  %p103_p4 = scmp.lt.s32.totalorder %s16_s10, %s16_s10 }
   0x9   :  { %p99_p3 = scmp.ne.s32.totalorder %s16_s10, %s98_s18  ;;  %p104_p5 = scmp.lt.s32.totalorder %s98_s18, %s98_s18 }
   0xb   :  { %p105_p6 = por %p104_p5, %p103_p4 }
   0xd   :  { %p106_p7 = pnand %p105_p6, %p99_p3 }
   0xf   :  { %109 = shalt.err (!%p106_p7)
}
  0x10   :  { %18 = dma.hbm_to_vmem [thread:$0]  %s183_s0, 256, %s16_s10, [#allocation3]  }
  0x11   :  { %132 = dma.done.wait [#allocation3], 256  }
  0x12   :  { %133 = vsyncadd [#allocation3], 4294967040  ;;  %v24_v0 = vld [vmem:[#allocation2] sm:$0xff]  ;;  %v25_v1 = vld [vmem:[#allocation2 + $0x8] sm:$0xff]  ;;  %v137_v10 = vmov 0   ;;  %v138_v14 = vmov 1  }
  0x13   :  { %v26_v2 = vadd.f32 %v25_v1, %v24_v0  ;;  %84 = vset.pattern.permute.xlu1 %v137_v10  ;;  %85 = vset.pattern.permute.xlu0 %v138_v14  ;;  %v40_v15 = vld [vmem:[%s184_s1] sm:$0xff]  ;;  %s139_s22 = smov 1   ;;  %s140_s23 = smov [#allocation5]  }
  0x14   :  { %s70_s24 = sshll.u32 %s140_s23, 4  ;;  %s71_s24 = int_to_ptr.vmem [resolvable:$true] %s70_s24 }
  0x15   :  { %27 = vadd.xlane.f32.xlu0 %v26_v2  ;;  %s110_s1 = scalar_lea.vmem %s71_s24, 256  ;;  %p115_p9 = scmp.lt.s32.totalorder %s71_s24, %s71_s24 }
  0x16   :  { %p111_p8 = scmp.ne.s32.totalorder %s71_s24, %s110_s1  ;;  %p116_p10 = scmp.lt.s32.totalorder %s110_s1, %s110_s1 }
  0x18   :  { %p117_p11 = por %p116_p10, %p115_p9 }
  0x1a   :  { %p118_p12 = pnand %p117_p11, %p111_p8 }
  0xa2   :  { %v28_v3 = vpop.xlane.xlu0 %27 }
  0xa3   :  { %v29_v4 = vmul.f32 0.00390625, %v28_v3 }
  0xa5   :  { %v30_v5 = vsub.f32 %v24_v0, %v29_v4  ;;  %v31_v6 = vsub.f32 %v25_v1, %v29_v4 }
  0xa7   :  { %v32_v7 = vmul.f32 %v30_v5, %v30_v5  ;;  %v33_v8 = vmul.f32 %v31_v6, %v31_v6 }
  0xa9   :  { %v34_v9 = vadd.f32 %v33_v8, %v32_v7 }
  0xab   :  { %35 = vadd.xlane.f32.xlu0 %v34_v9 }
 0x138   :  { %v36_v11 = vpop.xlane.xlu0 %35 }
 0x139   :  { %v37_v12 = vmul.f32 0.00390625, %v36_v11 }
 0x13b   :  { %v38_v13 = vadd.f32 1e-05, %v37_v12 }
 0x13d   :  { %86 = vrsqrt.f32 %v38_v13 }
 0x147   :  { %v87_v16 = vpop.eup %86 }
 0x148   :  { %v41_v17 = vmul.f32 %v87_v16, %v40_v15 }
 0x14a   :  { %v42_v18 = vmul.f32 %v41_v17, %v29_v4 }
 0x14c   :  { %44 = vrot.lane.b32.xlu1 %v42_v18, %s139_s22 }
 0x150   :  { %50 = vperm.xlu1 %84, %v41_v17  }
 0x1be   :  { %v45_v19 = vpop.permute.xlu1 %44 }
 0x1bf   :  { %v47_v20 = vsub.f32 %v40_v15, %v45_v19 }
 0x1c1   :  { %57 = vperm.xlu0 %85, %v47_v20  }
 0x1cf   :  { %v51_v21 = vpop.permute.xlu1 %50 }
 0x1d0   :  { %v53_v22 = vmul.f32 %v51_v21, %v24_v0  ;;  %v54_v23 = vmul.f32 %v51_v21, %v25_v1 }
 0x240   :  { %v58_v24 = vpop.permute.xlu0 %57 }
 0x241   :  { %v60_v25 = vadd.f32 %v58_v24, %v53_v22  ;;  %v61_v26 = vadd.f32 %v58_v24, %v54_v23 }
 0x243   :  { %62 = vst [vmem:[#allocation5] sm:$0xff] %v60_v25  ;;  %63 = vst [vmem:[#allocation5 + $0x8] sm:$0xff] %v61_v26 }
 0x244   :  { %121 = shalt.err (!%p118_p12)
}
 0x245   :  { %s122_s27 = scalar_lea.hbm %s185_s2, 256 }
 0x246   :  { %p123_p13 = scmp.ne.s32.totalorder %s185_s2, %s122_s27  ;;  %p126_p0 = scmp.lt.u32.totalorder %s122_s27, %s185_s2 }
 0x248   :  { %p128_p1 = pnand %p126_p0, %p123_p13 }
 0x24a   :  { %131 = shalt.err (!%p128_p1)
}
 0x24b   :  { %73 = dma.vmem_to_hbm [thread:$0]  %s71_s24, 256, %s185_s2, [#allocation4]  }
 0x24c   :  { %134 = dma.done.wait [#allocation4], 256  }
 0x24d   :  { %135 = vsyncadd [#allocation4], 4294967040 }
 0x24e   :  { %77 = vsyncpa [#allocation3], 1 }
 0x24f   :  { %78 = vsyncpa [#allocation4], 1 }

</bundles_post_ra>
